<compile_context>
chip_gen: v6e
topology: v6e:2x2x1
jax: 0.10.0
libtpu: 0.0.40
codegen_flags: <defaults>
</compile_context>

<pallas_src>
import functools

import jax
import jax.numpy as jnp
from jax.experimental import pallas as pl
from jax.experimental.pallas import tpu as pltpu


def _project3d_kernel(p_ref, pts_ref, out_ref, *, eps):
    # p_ref:   (B, 12)    SMEM, row-major 3x4 projection matrix per batch
    #                     (rows 0/1 pre-scaled by 2/(W-1), 2/(H-1))
    # pts_ref: (1, 4, TN) VMEM tile of homogeneous points
    # out_ref: (1, 2, TN) VMEM tile of normalized pixel coords
    b = pl.program_id(0)
    pts = pts_ref[0]                                    # (4, TN) f32

    def row(r):
        base = 4 * r
        return (p_ref[b, base + 0] * pts[0:1, :]
                + p_ref[b, base + 1] * pts[1:2, :]
                + p_ref[b, base + 2] * pts[2:3, :]
                + p_ref[b, base + 3] * pts[3:4, :])     # (1, TN)

    cam_x = row(0)                                      # already * 2/(W-1)
    cam_y = row(1)                                      # already * 2/(H-1)
    cam_z = row(2)

    inv_z = 1.0 / (cam_z + eps)
    x = cam_x * inv_z - 1.0
    y = cam_y * inv_z - 1.0

    # One lane-dense (2, TN) store (no masked sub-sublane writes).
    out_ref[0] = jnp.concatenate([x, y], axis=0).astype(out_ref.dtype)


# Cap the lane tile so (in + out) double-buffered blocks stay ~8 MiB of VMEM:
# per step ~= 2 * (8*TN*4 + 8*TN*4) bytes = 128*TN bytes -> 8 MiB at TN=64K.
_TN_CAP = 65536


def _pick_tile(n, batch):
    """Largest lane tile that is a multiple of 128, divides N and fits VMEM."""
    if n % 128 != 0:
        return n                     # block must equal the full dim otherwise
    cap = min(_TN_CAP, n)
    tn = 128
    t = cap - (cap % 128)
    while t >= 128:
        if n % t == 0:
            tn = t
            break
        t -= 128
    # Keep >= 2 grid steps so both v7x TensorCores get work.
    if batch * (n // tn) < 2 and tn % 256 == 0:
        tn //= 2
    return tn


def project_3d(points, K, T, *, batch_size, height, width, eps=1e-7):
    """JAX/Pallas equivalent of Project3D.forward.

    points: (B, 4, H*W)  float32
    K, T  : (B, 4, 4)    float32
    returns (B, H, W, 2) float32
    """
    B = batch_size
    N = height * width
    assert points.shape == (B, 4, N)

    # Tiny per-batch 4x4 matmul: plain-JAX glue.
    P = jnp.matmul(K, T)[:, :3, :]                      # (B, 3, 4)
    # Fold pixel normalization into P: row0 *= 2/(W-1), row1 *= 2/(H-1).
    scale = jnp.array([2.0 / (width - 1), 2.0 / (height - 1), 1.0],
                      dtype=jnp.float32)
    P = P.astype(jnp.float32) * scale[None, :, None]
    P_flat = P.reshape(B, 12)                           # SMEM-friendly 2D

    TN = _pick_tile(N, B)
    grid = (B, N // TN)

    kernel = functools.partial(_project3d_kernel, eps=eps)

    out = pl.pallas_call(
        kernel,
        out_shape=jax.ShapeDtypeStruct((B, 2, N), jnp.float32),
        grid_spec=pltpu.PrefetchScalarGridSpec(
            num_scalar_prefetch=0,
            grid=grid,
            in_specs=[
                # Whole (B, 12) projection-matrix table lives in SMEM.
                pl.BlockSpec(memory_space=pltpu.MemorySpace.SMEM),
                pl.BlockSpec((1, 4, TN), lambda b, n: (b, 0, n)),
            ],
            out_specs=pl.BlockSpec((1, 2, TN), lambda b, n: (b, 0, n)),
        ),
        compiler_params=pltpu.CompilerParams(
            dimension_semantics=("parallel", "parallel")),
    )(P_flat, points)

    # Layout glue: (B, 2, N) -> (B, 2, H, W) -> (B, H, W, 2)
    pix = out.reshape(B, 2, height, width)
    return jnp.transpose(pix, (0, 2, 3, 1))


def project_3d_ref(points, K, T, *, batch_size, height, width, eps=1e-7):
    """Pure-JAX reference mirroring the PyTorch forward."""
    P = jnp.matmul(K, T)[:, :3, :]
    cam = jnp.matmul(P, points)                         # (B, 3, N)
    pix = cam[:, :2, :] / (cam[:, 2:3, :] + eps)
    pix = pix.reshape(batch_size, 2, height, width)
    pix = jnp.transpose(pix, (0, 2, 3, 1))
    pix = pix.at[..., 0].divide(width - 1)
    pix = pix.at[..., 1].divide(height - 1)
    return (pix - 0.5) * 2.0


if __name__ == "__main__":
    B, H, W = 2, 16, 16
    N = H * W
    key = jax.random.PRNGKey(0)
    k1, k2, k3 = jax.random.split(key, 3)

    # Deterministic synthetic inputs (no checkpoint loading).
    points = jax.random.normal(k1, (B, 4, N), dtype=jnp.float32)
    points = points.at[:, 3, :].set(1.0)                # homogeneous coordinate

    # Plausible intrinsics (embedded in 4x4) and a near-identity pose.
    K = jnp.tile(
        jnp.array([[W / 2.0, 0.0, W / 2.0, 0.0],
                   [0.0, H / 2.0, H / 2.0, 0.0],
                   [0.0, 0.0, 1.0, 0.0],
                   [0.0, 0.0, 0.0, 1.0]], dtype=jnp.float32)[None], (B, 1, 1))
    T = jnp.tile(jnp.eye(4, dtype=jnp.float32)[None], (B, 1, 1)) \
        + 0.01 * jax.random.normal(k3, (B, 4, 4), dtype=jnp.float32)

    out = project_3d(points, K, T, batch_size=B, height=H, width=W)
    out = jax.block_until_ready(out)

    ref = project_3d_ref(points, K, T, batch_size=B, height=H, width=W)
    assert out.shape == (B, H, W, 2)
    assert jnp.allclose(out, ref, atol=1e-4, rtol=1e-4)

    print("KERNEL_OK")
</pallas_src>

<mosaic_0001>
module attributes {stable_mosaic.version = 11 : i64} {
  func.func @_project3d_kernel(%arg0: i32, %arg1: i32, %arg2: memref<2x12xf32, #tpu.memory_space<smem>>, %arg3: memref<1x4x256xf32, #tpu.memory_space<vmem>>, %arg4: memref<1x2x256xf32, #tpu.memory_space<vmem>>) attributes {dimension_semantics = [#tpu.dimension_semantics<parallel>, #tpu.dimension_semantics<parallel>], iteration_bounds = array<i64: 2, 1>, scalar_prefetch = 0 : i64, scratch_operands = 0 : i64, tpu.core_type = #tpu.core_type<tc>, window_params = [{transform_indices = @transform_0, window_bounds = array<i64: 2, 12>}, {transform_indices = @transform_1, window_bounds = array<i64: 1, 4, 256>}, {transform_indices = @transform_2, window_bounds = array<i64: 1, 2, 256>}]} {
    %c0 = arith.constant 0 : index
    %c0_0 = arith.constant 0 : index
    %c0_1 = arith.constant 0 : index
    %0 = vector.load %arg3[%c0, %c0_0, %c0_1] : memref<1x4x256xf32, #tpu.memory_space<vmem>>, vector<1x4x256xf32>
    %1 = vector.shape_cast %0 : vector<1x4x256xf32> to vector<4x256xf32>
    %2 = arith.index_cast %arg0 : i32 to index
    %c0_2 = arith.constant 0 : index
    %3 = memref.load %arg2[%2, %c0_2] : memref<2x12xf32, #tpu.memory_space<smem>>
    %4 = vector.extract_strided_slice %1 {offsets = [0, 0], sizes = [1, 256], strides = [1, 1]} : vector<4x256xf32> to vector<1x256xf32>
    %5 = vector.broadcast %3 : f32 to vector<1x256xf32>
    %6 = arith.mulf %5, %4 : vector<1x256xf32>
    %7 = arith.index_cast %arg0 : i32 to index
    %c1 = arith.constant 1 : index
    %8 = memref.load %arg2[%7, %c1] : memref<2x12xf32, #tpu.memory_space<smem>>
    %9 = vector.extract_strided_slice %1 {offsets = [1, 0], sizes = [1, 256], strides = [1, 1]} : vector<4x256xf32> to vector<1x256xf32>
    %10 = vector.broadcast %8 : f32 to vector<1x256xf32>
    %11 = arith.mulf %10, %9 : vector<1x256xf32>
    %12 = arith.addf %6, %11 : vector<1x256xf32>
    %13 = arith.index_cast %arg0 : i32 to index
    %c2 = arith.constant 2 : index
    %14 = memref.load %arg2[%13, %c2] : memref<2x12xf32, #tpu.memory_space<smem>>
    %15 = vector.extract_strided_slice %1 {offsets = [2, 0], sizes = [1, 256], strides = [1, 1]} : vector<4x256xf32> to vector<1x256xf32>
    %16 = vector.broadcast %14 : f32 to vector<1x256xf32>
    %17 = arith.mulf %16, %15 : vector<1x256xf32>
    %18 = arith.addf %12, %17 : vector<1x256xf32>
    %19 = arith.index_cast %arg0 : i32 to index
    %c3 = arith.constant 3 : index
    %20 = memref.load %arg2[%19, %c3] : memref<2x12xf32, #tpu.memory_space<smem>>
    %21 = vector.extract_strided_slice %1 {offsets = [3, 0], sizes = [1, 256], strides = [1, 1]} : vector<4x256xf32> to vector<1x256xf32>
    %22 = vector.broadcast %20 : f32 to vector<1x256xf32>
    %23 = arith.mulf %22, %21 : vector<1x256xf32>
    %24 = arith.addf %18, %23 : vector<1x256xf32>
    %25 = arith.index_cast %arg0 : i32 to index
    %c4 = arith.constant 4 : index
    %26 = memref.load %arg2[%25, %c4] : memref<2x12xf32, #tpu.memory_space<smem>>
    %27 = vector.extract_strided_slice %1 {offsets = [0, 0], sizes = [1, 256], strides = [1, 1]} : vector<4x256xf32> to vector<1x256xf32>
    %28 = vector.broadcast %26 : f32 to vector<1x256xf32>
    %29 = arith.mulf %28, %27 : vector<1x256xf32>
    %30 = arith.index_cast %arg0 : i32 to index
    %c5 = arith.constant 5 : index
    %31 = memref.load %arg2[%30, %c5] : memref<2x12xf32, #tpu.memory_space<smem>>
    %32 = vector.extract_strided_slice %1 {offsets = [1, 0], sizes = [1, 256], strides = [1, 1]} : vector<4x256xf32> to vector<1x256xf32>
    %33 = vector.broadcast %31 : f32 to vector<1x256xf32>
    %34 = arith.mulf %33, %32 : vector<1x256xf32>
    %35 = arith.addf %29, %34 : vector<1x256xf32>
    %36 = arith.index_cast %arg0 : i32 to index
    %c6 = arith.constant 6 : index
    %37 = memref.load %arg2[%36, %c6] : memref<2x12xf32, #tpu.memory_space<smem>>
    %38 = vector.extract_strided_slice %1 {offsets = [2, 0], sizes = [1, 256], strides = [1, 1]} : vector<4x256xf32> to vector<1x256xf32>
    %39 = vector.broadcast %37 : f32 to vector<1x256xf32>
    %40 = arith.mulf %39, %38 : vector<1x256xf32>
    %41 = arith.addf %35, %40 : vector<1x256xf32>
    %42 = arith.index_cast %arg0 : i32 to index
    %c7 = arith.constant 7 : index
    %43 = memref.load %arg2[%42, %c7] : memref<2x12xf32, #tpu.memory_space<smem>>
    %44 = vector.extract_strided_slice %1 {offsets = [3, 0], sizes = [1, 256], strides = [1, 1]} : vector<4x256xf32> to vector<1x256xf32>
    %45 = vector.broadcast %43 : f32 to vector<1x256xf32>
    %46 = arith.mulf %45, %44 : vector<1x256xf32>
    %47 = arith.addf %41, %46 : vector<1x256xf32>
    %48 = arith.index_cast %arg0 : i32 to index
    %c8 = arith.constant 8 : index
    %49 = memref.load %arg2[%48, %c8] : memref<2x12xf32, #tpu.memory_space<smem>>
    %50 = vector.extract_strided_slice %1 {offsets = [0, 0], sizes = [1, 256], strides = [1, 1]} : vector<4x256xf32> to vector<1x256xf32>
    %51 = vector.broadcast %49 : f32 to vector<1x256xf32>
    %52 = arith.mulf %51, %50 : vector<1x256xf32>
    %53 = arith.index_cast %arg0 : i32 to index
    %c9 = arith.constant 9 : index
    %54 = memref.load %arg2[%53, %c9] : memref<2x12xf32, #tpu.memory_space<smem>>
    %55 = vector.extract_strided_slice %1 {offsets = [1, 0], sizes = [1, 256], strides = [1, 1]} : vector<4x256xf32> to vector<1x256xf32>
    %56 = vector.broadcast %54 : f32 to vector<1x256xf32>
    %57 = arith.mulf %56, %55 : vector<1x256xf32>
    %58 = arith.addf %52, %57 : vector<1x256xf32>
    %59 = arith.index_cast %arg0 : i32 to index
    %c10 = arith.constant 10 : index
    %60 = memref.load %arg2[%59, %c10] : memref<2x12xf32, #tpu.memory_space<smem>>
    %61 = vector.extract_strided_slice %1 {offsets = [2, 0], sizes = [1, 256], strides = [1, 1]} : vector<4x256xf32> to vector<1x256xf32>
    %62 = vector.broadcast %60 : f32 to vector<1x256xf32>
    %63 = arith.mulf %62, %61 : vector<1x256xf32>
    %64 = arith.addf %58, %63 : vector<1x256xf32>
    %65 = arith.index_cast %arg0 : i32 to index
    %c11 = arith.constant 11 : index
    %66 = memref.load %arg2[%65, %c11] : memref<2x12xf32, #tpu.memory_space<smem>>
    %67 = vector.extract_strided_slice %1 {offsets = [3, 0], sizes = [1, 256], strides = [1, 1]} : vector<4x256xf32> to vector<1x256xf32>
    %68 = vector.broadcast %66 : f32 to vector<1x256xf32>
    %69 = arith.mulf %68, %67 : vector<1x256xf32>
    %70 = arith.addf %64, %69 : vector<1x256xf32>
    %cst = arith.constant 1.000000e-07 : f32
    %71 = vector.broadcast %cst : f32 to vector<1x256xf32>
    %72 = arith.addf %70, %71 : vector<1x256xf32>
    %cst_3 = arith.constant 1.000000e+00 : f32
    %73 = vector.broadcast %cst_3 : f32 to vector<1x256xf32>
    %74 = arith.divf %73, %72 : vector<1x256xf32>
    %75 = arith.mulf %24, %74 : vector<1x256xf32>
    %cst_4 = arith.constant 1.000000e+00 : f32
    %76 = vector.broadcast %cst_4 : f32 to vector<1x256xf32>
    %77 = arith.subf %75, %76 : vector<1x256xf32>
    %78 = arith.mulf %47, %74 : vector<1x256xf32>
    %cst_5 = arith.constant 1.000000e+00 : f32
    %79 = vector.broadcast %cst_5 : f32 to vector<1x256xf32>
    %80 = arith.subf %78, %79 : vector<1x256xf32>
    %81 = tpu.concatenate %77, %80 in 0 : vector<1x256xf32>, vector<1x256xf32> -> vector<2x256xf32>
    %c0_6 = arith.constant 0 : index
    %c0_7 = arith.constant 0 : index
    %c0_8 = arith.constant 0 : index
    %82 = vector.load %arg4[%c0_6, %c0_7, %c0_8] : memref<1x2x256xf32, #tpu.memory_space<vmem>>, vector<1x2x256xf32>
    %83 = vector.shape_cast %82 : vector<1x2x256xf32> to vector<2x256xf32>
    %84 = vector.shape_cast %81 : vector<2x256xf32> to vector<1x2x256xf32>
    tpu.vector_store %arg4[%c0_6, %c0_7, %c0_8], %84 {strides = array<i32>} : memref<1x2x256xf32, #tpu.memory_space<vmem>>, vector<1x2x256xf32>,
    return
  }
  func.func @transform_0(%arg0: i32, %arg1: i32) -> (i32, i32) {
    %c0_i32 = arith.constant 0 : i32
    %c0_i32_0 = arith.constant 0 : i32
    %c0_i32_1 = arith.constant 0 : i32
    return %c0_i32, %c0_i32_0 : i32, i32
  }
  func.func @transform_1(%arg0: i32, %arg1: i32) -> (i32, i32, i32) {
    %c0_i32 = arith.constant 0 : i32
    %c0_i32_0 = arith.constant 0 : i32
    return %arg0, %c0_i32, %arg1 : i32, i32, i32
  }
  func.func @transform_2(%arg0: i32, %arg1: i32) -> (i32, i32, i32) {
    %c0_i32 = arith.constant 0 : i32
    %c0_i32_0 = arith.constant 0 : i32
    return %arg0, %c0_i32, %arg1 : i32, i32, i32
  }
}

</mosaic_0001>

<bundles_post_ra>
// kernel: tpu_custom_call.1
= control target key start
LH: loop header
LB: loop body
LE: loop exit
PB: predicated region body
PF: predicated region fallthrough
CT: control target
= control target key end

     0   :  { %s895_s0 = inlined_call_operand.hbm [shape: f32[2,12], index: 0, kind: input, shape index: {}]   ;;  %s896_s1 = inlined_call_operand.hbm [shape: f32[2,4,256], index: 1, kind: input, shape index: {}]   ;;  %s897_s2 = inlined_call_operand.hbm [shape: f32[2,2,256], index: 2, kind: output, shape index: {}]  }
   0x1   :  { %899 = sst [smem:[#allocation11_spill]] %s895_s0 }
   0x2   :  { %900 = sst [smem:[#allocation12_spill]] %s896_s1 }
   0x3   :  { %7 = vsyncpa [#allocation5], 0 }
   0x4   :  { %8 = vsyncpa [#allocation3], 0 }
   0x5   :  { %10 = vsyncpa [#allocation3 + $0x1], 0 }
   0x6   :  { %11 = vsyncpa [#allocation4], 0 }
   0x7   :  { %13 = vsyncpa [#allocation4 + $0x1], 0  ;;  %s693_s9 = smov 0   ;;  %s695_s10 = smov 0  }
   0x8   :  { %s697_s11 = smov 0   ;;  %s699_s12 = smov 0  }
   0x9   :  { %s701_s13 = smov 0   ;;  %s703_s14 = smov 0  }
   0xa LB: > { %s443_s15 = sadd.s32 4294967295, %s673_s14   ;;  %s444_s16 = sadd.s32 4294967294, %s673_s14   ;;  %s673_s14 = sphi %s703_s14, %s19_s14   ;;  %s669_s13 = sphi %s701_s13, %s918_s13   ;;  %s665_s12 = sphi %s699_s12, %s917_s12   ;;  %s661_s11 = sphi %s697_s11, %s916_s11   ;;  %s657_s10 = sphi %s695_s10, %s915_s10   ;;  %s653_s9 = sphi %s693_s9, %s914_s9  }
   0xb   : > { %p74_p0 = scmp.ne.s32.totalorder %s657_s10, %s653_s9  ;;  %p727_p1 = scmp.eq.s32.totalorder %s443_s15, 0 }
   0xc   : > { %p731_p2 = scmp.eq.s32.totalorder %s443_s15, 1  ;;  %p106_p3 = scmp.eq.s32.totalorder %s444_s16, 1 }
   0xd   : > { %p737_p4 = por %p727_p1, %p74_p0  ;;  %p445_p5 = scmp.ge.s32.totalorder %s673_s14, 1 }
   0xe   : > { %p742_p6 = por %p106_p3, %p74_p0  ;;  %p113_p7 = scmp.lt.s32.totalorder %s673_s14, 3 }
   0xf   : > { %s31_s22 = sadd.s32 1, %s669_s13  ;;  %s61_s23 = sadd.s32 1, %s661_s11 }
  0x10   : > { %s904_s20 = scalar_select %p742_p6, 1, 0 }
  0x11   : > { %p747_p8 = pnand %p445_p5, %p113_p7  ;;  %p33_p12 = scmp.ge.s32.totalorder %s31_s22, 2 }
  0x12   : > { %p68_p13 = scmp.ne.s32.totalorder %s661_s11, %s657_s10  ;;  %p69_p0 = scmp.eq.s32.totalorder %s673_s14, 0 }
  0x13   : > { %p483_p10 = pneg %p747_p8  ;;  %s675_s24 = smov [#allocation2]  }
  0x14   : > { %s906_s0 = sld [smem:[#allocation11_spill]]  ;;  %s920_s22 = smov (%p33_p12, %s31_s22), 0 }
  0x15   : > { %p484_p11 = pnand %p483_p10, %p727_p1  ;;  %p766_p3 = por %p69_p0, %p68_p13 }
  0x16   : > { %p772_p5 = por %p731_p2, %p68_p13  ;;  %s56_s29 = ssub.s32 %s669_s13, %s920_s22 }
  0x17   : > { %p496_p7 = scmp.lt.s32.totalorder %s673_s14, 2  ;;  %p59_p10 = scmp.eq.s32.totalorder %s56_s29, 0 }
  0x18   : > { %s908_s28 = scalar_select %p772_p5, 1, 0 }
  0x19   : > { %s135_s30 = sand.u32 1, %s661_s11   ;;  %s473_s5 = sshll.u32 %s669_s13, 7 }
  0x1a   : > { %486 = dma.hbm_to_smem (!%p484_p11), %s906_s0, 32, %s675_s24, [#allocation5]  }
  0x1b   : > { %s448_s3 = sshll.u32 %s135_s30, 3  ;;  %s909_s1 = sld [smem:[#allocation12_spill]] }
  0x1c   : > { %s781_s4 = scalar_select %p59_p10, %s661_s11, %s61_s23  }
  0x1d   : > { %s139_s15 = scalar_lea.vmem [#allocation6], %s448_s3  ;;  %p789_p2 = pnand %p496_p7, %p766_p3 }
  0x1e   : > { %s149_s16 = sshll.u32 %s139_s15, 4  ;;  %s136_s24 = scalar_lea.sflag [#allocation3], %s135_s30  ;;  %s150_s16 = int_to_ptr.vmem [resolvable:$true] %s149_s16 }
  0x1f   : > { %p563_p11 = pneg %p789_p2  ;;  %s574_s25 = scalar_lea.vmem %s150_s16, 128 }
  0x20   : > { %p575_p12 = scmp.ne.s32.totalorder %s150_s16, %s574_s25  ;;  %s676_s23 = smov [#allocation6]  }
  0x21   : > { %s147_s8 = scalar_lea.hbm %s909_s1, %s473_s5  ;;  %s579_s26 = sshll.u32 %s676_s23, 4  ;;  %s580_s26 = int_to_ptr.vmem [resolvable:$false] %s579_s26 }
  0x22   : > { %p577_p13 = pnand %p575_p12, %p563_p11  ;;  %s581_s29 = scalar_lea.vmem %s580_s26, 256 }
  0x23   : > { %p582_p10 = scmp.lt.s32.totalorder %s150_s16, %s580_s26  ;;  %p583_p9 = scmp.lt.s32.totalorder %s581_s29, %s574_s25 }
  0x24   : > { %p578_p0 = pneg %p577_p13 }
  0x25   : > { %p584_p6 = por %p583_p9, %p582_p10 }
  0x27   : > { %p585_p5 = pnand %p584_p6, %p578_p0 }
  0x29   : > { %588 = shalt.err (!%p585_p5)
}
  0x2a   : > { %490 = dma.hbm_to_vmem [thread:$0]  (!%p789_p2), %s147_s8, 128, %s150_s16, %s136_s24  }
  0x2b   : > { %158 = sbr.rel (%p747_p8) target bundleno = 115 (0x73), region = 28 }
  0x30   : > { %640 = dma.done.wait (%p727_p1), [#allocation5], 32  }
  0x31   : > { %642 = vsyncadd (%p727_p1), [#allocation5], 4294967264  ;;  %s804_s27 = sand.u32 1, %s657_s10  }
  0x32   : > { %s453_s30 = sshll.u32 %s804_s27, 3  ;;  %s165_s3 = scalar_lea.sflag [#allocation3], %s804_s27 }
  0x33   : > { %s168_s5 = scalar_lea.vmem [#allocation6], %s453_s30 }
  0x34   : > { %644 = dma.done.wait (%p737_p4), %s165_s3, 128  }
  0x35   : > { %646 = vsyncadd (%p737_p4), %s165_s3, 4294967168 }
  0x36   : > { %173 = sfence }
  0x37   : > { %s813_s21 = sshll.u32 %s665_s12, 7  ;;  %v192_v0 = vld [vmem:[%s168_s5] sm:$0xff]  ;;  %v294_v38 = vlaneseq  ;;  %vm315_vm0 = vcmask 1040384   ;;  %p911_p4 = scmp.ne.s32.totalorder %s908_s28, 0 }
  0x38   : > { %s197_s17 = sadd.s32 1, %s813_s21  ;;  %s228_s6 = sadd.s32 5, %s813_s21 }
  0x39   : > { %s817_s7 = sld [smem:[#allocation2 + %s197_s17]]  ;;  %s255_s19 = sadd.s32 8, %s813_s21  ;;  %v295_v45 = vshrl.u32 %v294_v38, 7 }
  0x3a   : > { %s820_s8 = sld [smem:[#allocation2 + %s228_s6]]  ;;  %s259_s15 = sadd.s32 9, %s813_s21 }
  0x3b   : > { %s256_s16 = sld [smem:[#allocation2 + %s255_s19]]  ;;  %s268_s18 = sadd.s32 10, %s813_s21  ;;  %v296_v49 = vsub.s32 0, %v295_v45  ;;  %v300_v50 = vsub.s32 4, %v295_v45 }
  0x3c   : > { %s260_s24 = sld [smem:[#allocation2 + %s259_s15]]  ;;  %s277_s25 = sadd.s32 11, %s813_s21 }
  0x3d   : > { %s206_s23 = sadd.s32 2, %s813_s21  ;;  %s269_s26 = sld [smem:[#allocation2 + %s268_s18]] }
  0x3e   : > { %s224_s29 = sadd.s32 4, %s813_s21  ;;  %s278_s30 = sld [smem:[#allocation2 + %s277_s25]] }
  0x3f   : > { %s828_s3 = sld [smem:[#allocation2 + %s813_s21]]  ;;  %s237_s0 = sadd.s32 6, %s813_s21  ;;  %v199_v7 = vstv %s817_s7 }
  0x40   : > { %s831_s17 = sld [smem:[#allocation2 + %s206_s23]]  ;;  %s215_s6 = sadd.s32 3, %s813_s21  ;;  %v230_v11 = vstv %s820_s8  ;;  %v200_v15 = vmul.f32 %v199_v7, %v192_v0 }
  0x41   : > { %s834_s1 = sld [smem:[#allocation2 + %s224_s29]]  ;;  %v257_v1 = vstv %s256_s16  ;;  %s246_s15 = sadd.s32 7, %s813_s21  ;;  %v231_v18 = vmul.f32 %v230_v11, %v192_v0 }
  0x42   : > { %s836_s19 = sld [smem:[#allocation2 + %s237_s0]]  ;;  %v261_v2 = vstv %s260_s24  ;;  %v258_v3 = vmul.f32 %v257_v1, %v192_v0  ;;  %v456_v24 = vrot.slane %v200_v15, 9  ;;  %s474_s7 = sshll.u32 %s665_s12, 6 }
  0x43   : > { %v262_v4 = vmul.f32 %v261_v2, %v192_v0  ;;  %s839_s18 = sld [smem:[#allocation2 + %s215_s6]]  ;;  %v270_v5 = vstv %s269_s26  ;;  %v459_v28 = vrot.slane %v231_v18, 9  ;;  %s345_s24 = scalar_lea.hbm %s897_s2, %s474_s7 }
  0x44   : > { %v279_v6 = vstv %s278_s30  ;;  %v271_v9 = vmul.f32 %v270_v5, %v192_v0  ;;  %s247_s0 = sld [smem:[#allocation2 + %s246_s15]]  ;;  %s331_s25 = scalar_lea.sflag [#allocation4], %s804_s27 }
  0x45   : > { %v462_v8 = vrot.slane %v262_v4, 9  ;;  %v280_v10 = vmul.f32 %v279_v6, %v192_v0  ;;  %v195_v16 = vstv %s828_s3  ;;  %s677_s12 = smov [#allocation7]  }
  0x46   : > { %v463_v13 = vrot.slane %v271_v9, 10  ;;  %v208_v17 = vstv %s831_s17  ;;  %v196_v23 = vmul.f32 %v195_v16, %v192_v0  ;;  %s593_s26 = sshll.u32 %s677_s12, 4  ;;  %s594_s26 = int_to_ptr.vmem [resolvable:$false] %s593_s26 }
  0x47   : > { %v267_v12 = vadd.f32 %v462_v8, %v258_v3  ;;  %v464_v14 = vrot.slane %v280_v10, 11  ;;  %v226_v20 = vstv %s834_s1  ;;  %v209_v25 = vmul.f32 %v208_v17, %v192_v0  ;;  %s454_s1 = sshll.u32 %s804_s27, 2  ;;  %s595_s29 = scalar_lea.vmem %s594_s26, 128 }
  0x48   : > { %v239_v21 = vstv %s836_s19  ;;  %v227_v27 = vmul.f32 %v226_v20, %v192_v0  ;;  %v205_v34 = vadd.f32 %v456_v24, %v196_v23  ;;  %s189_s5 = scalar_lea.vmem [#allocation7], %s454_s1 }
  0x49   : > { %v276_v19 = vadd.f32 %v463_v13, %v267_v12  ;;  %v217_v26 = vstv %s839_s18  ;;  %v240_v29 = vmul.f32 %v239_v21, %v192_v0  ;;  %v457_v32 = vrot.slane %v209_v25, 10  ;;  %s347_s21 = sshll.u32 %s189_s5, 4  ;;  %s850_s21 = int_to_ptr.vmem [resolvable:$true] %s347_s21 }
  0x4a   : > { %v248_v31 = vstv %s247_s0  ;;  %v218_v33 = vmul.f32 %v217_v26, %v192_v0  ;;  %v236_v35 = vadd.f32 %v459_v28, %v227_v27  ;;  %s589_s23 = scalar_lea.vmem %s850_s21, 64  ;;  %p596_p9 = scmp.lt.s32.totalorder %s850_s21, %s594_s26 }
  0x4b   : > { %v285_v22 = vadd.f32 %v464_v14, %v276_v19  ;;  %v460_v36 = vrot.slane %v240_v29, 10  ;;  %v249_v37 = vmul.f32 %v248_v31, %v192_v0  ;;  %v214_v39 = vadd.f32 %v457_v32, %v205_v34  ;;  %p590_p1 = scmp.ne.s32.totalorder %s850_s21, %s589_s23  ;;  %p597_p3 = scmp.lt.s32.totalorder %s595_s29, %s589_s23 }
  0x4c   : > { %v458_v40 = vrot.slane %v218_v33, 11 }
  0x4d   : > { %v286_v30 = vadd.f32 1e-07, %v285_v22  ;;  %v245_v41 = vadd.f32 %v460_v36, %v236_v35  ;;  %v461_v42 = vrot.slane %v249_v37, 11  ;;  %p591_p6 = pnand %p590_p1, %p911_p4  ;;  %p598_p5 = por %p597_p3, %p596_p9 }
  0x4e   : > { %v223_v43 = vadd.f32 %v458_v40, %v214_v39 }
  0x4f   : > { %548 = vrcp.f32 %v286_v30  ;;  %v254_v44 = vadd.f32 %v461_v42, %v245_v41  ;;  %p592_p8 = pneg %p591_p6 }
  0x51   : > { %p599_p7 = pnand %p598_p5, %p592_p8 }
  0x5c   : > { %v549_v46 = vpop.eup %548 }
  0x5d   : > { %v289_v47 = vmul.f32 %v549_v46, %v223_v43  ;;  %v291_v48 = vmul.f32 %v549_v46, %v254_v44 }
  0x5f   : > { %v465_v51 = vadd.f32 -1.0, %v289_v47  ;;  %v466_v52 = vadd.f32 -1.0, %v291_v48 }
  0x61   : > { %v297_v53 = vrot.slane %v465_v51, %v296_v49  ;;  %v301_v54 = vrot.slane %v465_v51, %v300_v50  ;;  %v308_v55 = vrot.slane %v466_v52, %v296_v49  ;;  %v312_v56 = vrot.slane %v466_v52, %v300_v50 }
  0x63   : > { %v316_v57 = vsel %vm315_vm0, %v297_v53, %v308_v55  ;;  %v317_v58 = vsel %vm315_vm0, %v301_v54, %v312_v56 }
  0x64   : > { %v320_v59 = vcombine.low %v316_v57, %v317_v58 }
  0x66   : > { %467 = vst.sshfl [vmem:[%s189_s5] sm:$0x33 pattern:$0x76325410] %v320_v59 }
  0x67   : > { %602 = shalt.err (!%p599_p7)
}
  0x68   : > { %s603_s30 = scalar_lea.hbm %s345_s24, 64  ;;  %s607_s17 = scalar_lea.hbm %s897_s2, 128 }
  0x69   : > { %p604_p2 = scmp.ne.s32.totalorder %s345_s24, %s603_s30  ;;  %p608_p13 = scmp.lt.s32.totalorder %s345_s24, %s897_s2 }
  0x6a   : > { %p609_p0 = scmp.lt.s32.totalorder %s607_s17, %s603_s30 }
  0x6b   : > { %p605_p11 = pnand %p604_p2, %p911_p4 }
  0x6c   : > { %p610_p10 = por %p609_p0, %p608_p13 }
  0x6d   : > { %p606_p12 = pneg %p605_p11 }
  0x6f   : > { %p611_p1 = pnand %p610_p10, %p606_p12 }
  0x71   : > { %614 = shalt.err (!%p611_p1)
}
  0x72   : > { %481 = dma.vmem_to_hbm [thread:$0]  (%p911_p4), %s850_s21, 64, %s345_s24, %s331_s25  }
  0x73 PF: > { %s359_s15 = sand.u32 1, %s653_s9   ;;  %p912_p6 = scmp.ne.s32.totalorder %s904_s20, 0 }
  0x74   : > { %p913_p8 = scmp.ge.s32.totalorder %s673_s14, 2  ;;  %s360_s18 = scalar_lea.sflag [#allocation4], %s359_s15 }
  0x76   : > { %p492_p9 = pnand %p913_p8, %p912_p6 }
  0x78   : > { %p493_p3 = pneg %p492_p9 }
  0x7a   : > { %648 = dma.done.wait (%p493_p3), %s360_s18, 64  }
  0x7b   : > { %650 = vsyncadd (%p493_p3), %s360_s18, 4294967232  ;;  %s19_s14 = sadd.s32 1, %s673_s14   ;;  %s914_s9 = smov %s657_s10 }
  0x7c   : > { %p16_p5 = scmp.ge.s32.totalorder %s19_s14, 4   ;;  %s915_s10 = smov %s661_s11 }
  0x7d   : > { %s916_s11 = smov %s781_s4  ;;  %s917_s12 = smov %s669_s13 }
  0x7e   : > { %s918_s13 = smov %s920_s22  ;;  %18 = sbr.rel (!%p16_p5) target bundleno = 10 (0xa), region = 78 }
  0x83   :  { %365 = vsyncpa [#allocation3], 1 }
  0x84   :  { %367 = vsyncpa [#allocation3 + $0x1], 1 }
  0x85   :  { %368 = vsyncpa [#allocation4], 1 }
  0x86   :  { %370 = vsyncpa [#allocation4 + $0x1], 1 }
  0x87   :  { %371 = vsyncpa [#allocation5], 1 }
  0x88   :  { %373 = vsyncpa [#allocation5 + $0x1], 1 }

</bundles_post_ra>
